<compile_context>
chip_gen: v5e
topology: v5e:2x2
jax: 0.10.0
libtpu: 0.0.40
codegen_flags: <defaults>
</compile_context>

<pallas_src>
import jax
import jax.numpy as jnp
from jax import lax
from jax.experimental import pallas as pl
from jax.experimental.pallas import tpu as pltpu

_LANE_WIDTHS = (1024, 512, 256, 128)     # widest lane-dense last dim that divides n
_BLOCK_BYTES = 4 * 1024 * 1024           # fast-path tile; in+out double-buffered -> ~16 MiB peak
_VMEM_LIMIT_BYTES = 32 * 1024 * 1024     # explicit scoped VMEM: safe on v5e/v6e (128 MiB) and v7x (64 MiB)
_CHUNK_ELEMS = 128 * 1024                # ragged DMA chunk; (2, chunk) scratch pads to 32*chunk B = 4 MiB


def _copy_kernel(x_ref, o_ref):
    # Pure pass-through: copy the current VMEM tile to the output tile.
    o_ref[...] = x_ref[...]


def _ragged_dma_copy_kernel(x_hbm, o_hbm, buf, in_sem, out_sem):
    """Flat 1-D copy for sizes not divisible by 128.

    Double-buffered HBM -> VMEM -> HBM chunks driven entirely by DMA; the
    inbound DMA for chunk i overlaps the outbound DMA of chunk i-1.
    """
    chunk = buf.shape[1]                 # static
    total = x_hbm.shape[0]               # static
    nfull = total // chunk
    rem = total - nfull * chunk

    def in_copy(i, slot):
        return pltpu.make_async_copy(
            x_hbm.at[pl.ds(i * chunk, chunk)], buf.at[slot], in_sem.at[slot])

    def out_copy(i, slot):
        return pltpu.make_async_copy(
            buf.at[slot], o_hbm.at[pl.ds(i * chunk, chunk)], out_sem.at[slot])

    if nfull > 0:
        def body(i, carry):
            slot = i % 2

            @pl.when(i >= 2)
            def _():
                # Writeback issued from this slot two iterations ago must
                # finish before the slot is reused (only sem + size matter
                # for the wait; the index is a placeholder).
                out_copy(i, slot).wait()

            cp_in = in_copy(i, slot)
            cp_in.start()
            cp_in.wait()
            out_copy(i, slot).start()
            return carry

        lax.fori_loop(0, nfull, body, 0)

        # Drain the (up to two) writebacks still in flight.
        for k in range(min(2, nfull)):
            out_copy(0, (nfull - 1 - k) % 2).wait()

    if rem > 0:
        start = nfull * chunk
        cp_in = pltpu.make_async_copy(
            x_hbm.at[pl.ds(start, rem)], buf.at[0, pl.ds(0, rem)], in_sem.at[0])
        cp_in.start()
        cp_in.wait()
        cp_out = pltpu.make_async_copy(
            buf.at[0, pl.ds(0, rem)], o_hbm.at[pl.ds(start, rem)], out_sem.at[0])
        cp_out.start()
        cp_out.wait()


def _sublane_multiple(itemsize):
    # Full packed-vreg sublane count: 8 rows (4B), 16 rows (2B), 32 rows (1B).
    return max(8, 32 // max(1, int(itemsize)))


def _round_up(v, m):
    return ((v + m - 1) // m) * m


def _copy_aligned(x_flat, n, dtype, itemsize):
    """Tiled lane-dense copy for n divisible by 128."""
    width = next(w for w in _LANE_WIDTHS if n % w == 0)
    rows = n // width
    x2d = x_flat.reshape(rows, width)

    sub = _sublane_multiple(itemsize)
    budget_rows = max(sub, (_BLOCK_BYTES // (width * itemsize) // sub) * sub)
    if rows <= sub:
        block_rows = rows  # single full-extent block (allowed by the full-dim exception)
    else:
        # At least 2 grid steps so both v7x TensorCores can drive DMAs, but
        # never more rows per block than the ~4 MiB budget.  Always a
        # multiple of the packed sublane count; ragged last block is masked.
        block_rows = min(budget_rows, _round_up(pl.cdiv(rows, 2), sub))

    spec = pl.BlockSpec((block_rows, width), lambda i: (i, 0))
    out2d = pl.pallas_call(
        _copy_kernel,
        out_shape=jax.ShapeDtypeStruct((rows, width), dtype),
        grid=(pl.cdiv(rows, block_rows),),
        in_specs=[spec],
        out_specs=spec,
        compiler_params=pltpu.CompilerParams(
            dimension_semantics=("parallel",),
            vmem_limit_bytes=_VMEM_LIMIT_BYTES),
        cost_estimate=pl.CostEstimate(
            flops=0, transcendentals=0, bytes_accessed=2 * n * itemsize),
    )(x2d)
    return out2d.reshape(-1)


def _copy_ragged(x_flat, n, dtype, itemsize):
    """Pure-DMA copy for n not divisible by 128 (no (8,128) constraint)."""
    chunk = min(_CHUNK_ELEMS, n)
    return pl.pallas_call(
        _ragged_dma_copy_kernel,
        out_shape=jax.ShapeDtypeStruct((n,), dtype),
        in_specs=[pl.BlockSpec(memory_space=pl.ANY)],
        out_specs=pl.BlockSpec(memory_space=pl.ANY),
        scratch_shapes=[
            pltpu.VMEM((2, chunk), dtype),
            pltpu.SemaphoreType.DMA((2,)),
            pltpu.SemaphoreType.DMA((2,)),
        ],
        compiler_params=pltpu.CompilerParams(vmem_limit_bytes=_VMEM_LIMIT_BYTES),
        cost_estimate=pl.CostEstimate(
            flops=0, transcendentals=0, bytes_accessed=2 * n * itemsize),
    )(x_flat)


def identity_embedding_forward(x, params=None, kwargs=None, *, materialize_copy=False):
    """Pallas implementation of IdentityEmbedding.forward.

    Args:
      x: input array, any shape (NCHW in the demo). Returned unchanged.
      params: dict holding the (unused) nn.Linear(1, 1) weight/bias, kept only
        for parity with the PyTorch module's __init__.
      kwargs: unused dict argument, mirroring the PyTorch signature.
      materialize_copy: if False (default), short-circuit and return `x`
        directly — the only zero-byte identity.  If True, run the Pallas copy
        kernel to produce a freshly materialized buffer.
    """
    del params, kwargs  # forward() ignores both, exactly like the PyTorch module.

    if not materialize_copy:
        return x  # true identity: no kernel launch, zero HBM traffic

    n = int(x.size)
    if n == 0:
        return x
    dtype = x.dtype
    itemsize = int(jnp.dtype(dtype).itemsize)
    x_flat = x.reshape(-1)  # free metadata reshape of a row-major array

    if n % 128 == 0:
        out_flat = _copy_aligned(x_flat, n, dtype, itemsize)
    else:
        out_flat = _copy_ragged(x_flat, n, dtype, itemsize)
    return out_flat.reshape(x.shape)


def init_identity_embedding_params(in_channels, key):
    """Deterministic init of the module's (unused) nn.Linear(1, 1) parameters."""
    # TODO(synk): the nn.Linear(1,1) never participates in forward; kept only for parity.
    kw, kb = jax.random.split(key)
    return {
        "in_channels": in_channels,
        "out_channels": in_channels,
        "layer_weight": jax.random.uniform(kw, (1, 1), jnp.float32, -1.0, 1.0),
        "layer_bias": jax.random.uniform(kb, (1,), jnp.float32, -1.0, 1.0),
    }


if __name__ == "__main__":
    key = jax.random.PRNGKey(0)
    k_x, k_p, k_b, k_m, k_c, k_r = jax.random.split(key, 6)

    # Primary case: small NCHW tensor matching how the PyTorch module is used.
    batch, channels, h, w = 2, 4, 16, 16
    x = jax.random.normal(k_x, (batch, channels, h, w), dtype=jnp.float32)
    params = init_identity_embedding_params(channels, k_p)

    # Default path: true identity, no kernel launched.
    out0 = jax.block_until_ready(identity_embedding_forward(x, params, kwargs={}))
    assert out0.shape == x.shape and out0.dtype == x.dtype
    assert bool(jnp.array_equal(out0, x))

    # Explicitly materialized copy: runs the tiled Pallas copy kernel.
    out1 = jax.block_until_ready(
        identity_embedding_forward(x, params, kwargs={}, materialize_copy=True))
    assert bool(jnp.array_equal(out1, x))

    # bf16 input: exercises the 16-row sublane-packing branch of the fast path.
    xb = jax.random.normal(k_b, (2, 16, 8, 16), dtype=jnp.bfloat16)
    ob = jax.block_until_ready(identity_embedding_forward(xb, materialize_copy=True))
    assert ob.dtype == xb.dtype and bool(jnp.array_equal(ob, xb))

    # Mid-size aligned input: >=2 grid steps with a masked ragged last block.
    xm = jax.random.normal(k_m, (4, 3, 40, 128), dtype=jnp.float32)
    om = jax.block_until_ready(identity_embedding_forward(xm, materialize_copy=True))
    assert bool(jnp.array_equal(om, xm))

    # Tiny size not divisible by 128: DMA fallback, single partial chunk.
    xc = jax.random.normal(k_c, (3, 5, 7), dtype=jnp.float32)
    oc = jax.block_until_ready(identity_embedding_forward(xc, materialize_copy=True))
    assert bool(jnp.array_equal(oc, xc))

    # Ragged size spanning a full DMA chunk plus a tail (131075 elements).
    xr = jax.random.normal(k_r, (5, 26215), dtype=jnp.float32)
    orr = jax.block_until_ready(identity_embedding_forward(xr, materialize_copy=True))
    assert bool(jnp.array_equal(orr, xr))

    print("KERNEL_OK")
</pallas_src>

<mosaic_0001>
module attributes {stable_mosaic.version = 11 : i64} {
  func.func @_copy_kernel(%arg0: i32, %arg1: memref<2x1024xf32, #tpu.memory_space<vmem>>, %arg2: memref<2x1024xf32, #tpu.memory_space<vmem>>) attributes {dimension_semantics = [#tpu.dimension_semantics<parallel>], iteration_bounds = array<i64: 1>, scalar_prefetch = 0 : i64, scratch_operands = 0 : i64, tpu.core_type = #tpu.core_type<tc>, window_params = [{transform_indices = @transform_0, window_bounds = array<i64: 2, 1024>}, {transform_indices = @transform_1, window_bounds = array<i64: 2, 1024>}]} {
    %c0 = arith.constant 0 : index
    %c0_0 = arith.constant 0 : index
    %0 = vector.load %arg1[%c0, %c0_0] : memref<2x1024xf32, #tpu.memory_space<vmem>>, vector<2x1024xf32>
    %c0_1 = arith.constant 0 : index
    %c0_2 = arith.constant 0 : index
    %1 = vector.load %arg2[%c0_1, %c0_2] : memref<2x1024xf32, #tpu.memory_space<vmem>>, vector<2x1024xf32>
    tpu.vector_store %arg2[%c0_1, %c0_2], %0 {strides = array<i32>} : memref<2x1024xf32, #tpu.memory_space<vmem>>, vector<2x1024xf32>,
    return
  }
  func.func @transform_0(%arg0: i32) -> (i32, i32) {
    %c0_i32 = arith.constant 0 : i32
    %c0_i32_0 = arith.constant 0 : i32
    return %arg0, %c0_i32 : i32, i32
  }
  func.func @transform_1(%arg0: i32) -> (i32, i32) {
    %c0_i32 = arith.constant 0 : i32
    %c0_i32_0 = arith.constant 0 : i32
    return %arg0, %c0_i32 : i32, i32
  }
}

</mosaic_0001>

<bundles_post_ra>
// kernel: tpu_custom_call.1
= control target key start
LH: loop header
LB: loop body
LE: loop exit
PB: predicated region body
PF: predicated region fallthrough
CT: control target
= control target key end

     0   :  { %6 = vsyncpa [#allocation3], 0  ;;  %s116_s0 = inlined_call_operand.hbm [shape: f32[2,1024], index: 0, kind: input, shape index: {}]   ;;  %s117_s1 = inlined_call_operand.hbm [shape: f32[2,1024], index: 1, kind: output, shape index: {}]  }
   0x1   :  { %7 = vsyncpa [#allocation4], 0  ;;  %s13_s8 = sshll.u32 %s116_s0, 4  ;;  %s98_s9 = smov [#allocation2]   ;;  %s14_s8 = int_to_ptr.hbm [resolvable:$true] %s13_s8 }
   0x2   :  { %s15_s10 = sshll.u32 %s98_s9, 4  ;;  %s16_s10 = int_to_ptr.vmem [resolvable:$true] %s15_s10 }
   0x3   :  { %18 = dma.hbm_to_vmem [thread:$0]  %s14_s8, 256, %s16_s10, [#allocation3]  }
   0x4   :  { %94 = dma.done.wait [#allocation3], 256  }
   0x5   :  { %95 = vsyncadd [#allocation3], 4294967040  ;;  %s99_s11 = smov [#allocation5]   ;;  %s34_s15 = sshll.u32 %s117_s1, 4  ;;  %v23_v0 = vld [vmem:[#allocation2] sm:$0xff]  ;;  %v24_v1 = vld [vmem:[#allocation2 + $0x8] sm:$0xff]  ;;  %s35_s15 = int_to_ptr.hbm [resolvable:$true] %s34_s15 }
   0x6   :  { %s32_s12 = sshll.u32 %s99_s11, 4  ;;  %25 = vst [vmem:[#allocation5] sm:$0xff] %v23_v0  ;;  %s33_s12 = int_to_ptr.vmem [resolvable:$true] %s32_s12 }
   0x7   :  { %26 = vst [vmem:[#allocation5 + $0x8] sm:$0xff] %v24_v1 }
   0x8   :  { %37 = dma.vmem_to_hbm [thread:$0]  %s33_s12, 256, %s35_s15, [#allocation4]  }
   0x9   :  { %96 = dma.done.wait [#allocation4], 256  }
   0xa   :  { %97 = vsyncadd [#allocation4], 4294967040 }
   0xb   :  { %42 = vsyncpa [#allocation3], 1 }
   0xc   :  { %43 = vsyncpa [#allocation4], 1 }

</bundles_post_ra>
